<compile_context>
chip_gen: v7x
topology: tpu7x:2x2x1
jax: 0.10.0
libtpu: 0.0.40
codegen_flags: <defaults>
</compile_context>

<pallas_src>
import functools

import jax
import jax.numpy as jnp
from jax import lax
from jax.experimental import pallas as pl
from jax.experimental.pallas import tpu as pltpu


def _round_up(x, m):
    return (x + m - 1) // m * m


# ---------------------------------------------------------------------------
# In-kernel Gaussian noise
# ---------------------------------------------------------------------------
def _bits_to_two_uniforms(bits_u32):
    """Split each uint32 into two uniforms in [0, 1)."""
    hi = (bits_u32 >> jnp.uint32(16)).astype(jnp.int32).astype(jnp.float32)
    lo = (bits_u32 & jnp.uint32(0xFFFF)).astype(jnp.int32).astype(jnp.float32)
    scale = jnp.float32(1.0 / 65536.0)
    return hi * scale, lo * scale


def _approx_normal_from_bits(bits_a, bits_b):
    # Sum of four uniforms, centered/scaled to mean 0 / var 1 (Irwin-Hall 4).
    # TODO(synk): approximate Gaussian (tails truncated at ~3.46 sigma); the
    # hardware-PRNG path uses an exact normal sampler when available.
    u0, u1 = _bits_to_two_uniforms(bits_a)
    u2, u3 = _bits_to_two_uniforms(bits_b)
    return (u0 + u1 + u2 + u3 - 2.0) * jnp.float32(1.7320508075688772)


def _xorshift(x):
    x = x ^ (x << jnp.uint32(13))
    x = x ^ (x >> jnp.uint32(17))
    x = x ^ (x << jnp.uint32(5))
    return x


def _hash_bits(counter_u32, salt_u32):
    x = counter_u32 + salt_u32
    x = _xorshift(x)
    x = x + jnp.uint32(0x9E3779B9)
    x = _xorshift(x)
    return x


def _to_u32(bits):
    return bits if bits.dtype == jnp.uint32 else pltpu.bitcast(bits, jnp.uint32)


def _gaussian_noise(shape, seed_ref, row0, lanes, use_hw_prng):
    if use_hw_prng:
        # On-chip hardware PRNG: zero HBM traffic, near-zero VALU cost.
        pltpu.prng_seed(seed_ref[0], pl.program_id(0))
        if hasattr(pltpu, "stateful_normal"):
            return pltpu.stateful_normal(shape, jnp.float32)
        b1 = _to_u32(pltpu.prng_random_bits(shape))
        b2 = _to_u32(pltpu.prng_random_bits(shape))
        return _approx_normal_from_bits(b1, b2)
    # Portable counter-hash fallback (plain jnp ops only; runs on any backend,
    # including the CPU interpreter).  Deterministic given (seed, element
    # index) and independent of the tiling.
    r = lax.broadcasted_iota(jnp.int32, shape, 0)
    c = lax.broadcasted_iota(jnp.int32, shape, 1)
    idx = ((row0 + r) * lanes + c).astype(jnp.uint32)
    seed_u = seed_ref[0].astype(jnp.uint32)
    salt1 = seed_u * jnp.uint32(0x85EBCA6B) + jnp.uint32(0x9E3779B9)
    salt2 = seed_u * jnp.uint32(0xC2B2AE35) + jnp.uint32(0x7F4A7C15)
    return _approx_normal_from_bits(_hash_bits(idx, salt1), _hash_bits(idx, salt2))


# ---------------------------------------------------------------------------
# Kernel
# ---------------------------------------------------------------------------
def _gating_kernel(seed_ref,                                    # scalar prefetch (SMEM)
                   x_ref, w1_ref, b1_ref, w2_ref, b2_ref, w3_ref, b3_ref,
                   gated_ref, gate_ref, alpha_ref,
                   *, a, sigma, add_noise, use_hw_prng, tm, lanes):
    x = x_ref[...].astype(jnp.float32)                          # (tm, lanes) lane-dense
    xm = x.astype(w1_ref.dtype)                                 # bf16 for the MXU (default)

    # gating_layers: Linear -> ReLU -> Linear -> ReLU  (block-diagonal packed weights)
    h = jnp.dot(xm, w1_ref[...], preferred_element_type=jnp.float32) + b1_ref[...]
    h = jnp.maximum(h, 0.0)
    h = jnp.dot(h.astype(w2_ref.dtype), w2_ref[...],
                preferred_element_type=jnp.float32) + b2_ref[...]
    h = jnp.maximum(h, 0.0)

    # alpha_layer
    alpha = jnp.dot(h.astype(w3_ref.dtype), w3_ref[...],
                    preferred_element_type=jnp.float32) + b3_ref[...]

    if add_noise:
        row0 = pl.program_id(0) * tm
        noise = _gaussian_noise(alpha.shape, seed_ref, row0, lanes, use_hw_prng)
        z = alpha + sigma * noise
    else:
        z = alpha

    # hard sigmoid gate and elementwise gating
    gate = jnp.clip(a * z + 0.5, 0.0, 1.0)
    gated_ref[...] = (x * gate).astype(gated_ref.dtype)
    gate_ref[...] = gate.astype(gate_ref.dtype)
    alpha_ref[...] = alpha.astype(alpha_ref.dtype)


# ---------------------------------------------------------------------------
# Wrapper
# ---------------------------------------------------------------------------
def learned_feature_gating(x, params, seed=0, *, a=1.0, sigma=0.5,
                           train_gates=True, tile_rows=2048,
                           side_dtype=jnp.bfloat16, matmul_dtype=jnp.bfloat16,
                           use_hw_prng=None):
    """x: (batch, seq, feat_p_g, embed).  Returns (gated_x, gate, alpha).

    side_dtype / matmul_dtype default to bf16 (fast, mem-bound optimal); pass
    jnp.float32 for exact parity with the fp32 reference.
    """
    batch, seq, feat_p_g, embed = x.shape
    w1, b1, w2, b2, w3, b3 = params
    h1, h2 = w1.shape[1], w2.shape[1]
    n_rows = batch * seq * feat_p_g

    if use_hw_prng is None:
        use_hw_prng = jax.default_backend() == "tpu"

    # ---- lane-dense packing: `pack` logical rows share one 128-lane row ----
    pack = 128 // embed if (embed < 128 and 128 % embed == 0) else 1
    lanes = pack * embed

    x_flat = x.reshape(n_rows, embed)
    pad = (-n_rows) % pack
    if pad:
        # TODO(synk): tiny pad copy, only hit when n_rows is not a multiple of pack.
        x_flat = jnp.pad(x_flat, ((0, pad), (0, 0)))
    pr = (n_rows + pad) // pack                      # true packed-row count
    x_packed = x_flat.reshape(pr, lanes)             # contiguous reshape (no copy)

    # ---- tile / grid sizing: one maximal tile if it fits (1-TC chips), else
    # balanced steps rounded to an even count (keeps v7x's 2 TCs balanced).
    tm = min(_round_up(tile_rows, 16), _round_up(pr, 16))
    grid_m = pl.cdiv(pr, tm)
    if grid_m > 1 and grid_m % 2 == 1:
        tm_even = _round_up(pl.cdiv(pr, grid_m + 1), 16)
        if pl.cdiv(pr, tm_even) % 2 == 0:
            tm = tm_even
            grid_m = pl.cdiv(pr, tm)

    # ---- block-diagonal weights keep the packed matmuls exactly equivalent ----
    wdt = jnp.dtype(matmul_dtype)
    eye = jnp.eye(pack, dtype=w1.dtype)
    w1_p = jnp.kron(eye, w1).astype(wdt)             # (lanes, pack*h1)
    w2_p = jnp.kron(eye, w2).astype(wdt)             # (pack*h1, pack*h2)
    w3_p = jnp.kron(eye, w3).astype(wdt)             # (pack*h2, lanes)
    b1_p = jnp.tile(b1, pack).reshape(1, pack * h1).astype(jnp.float32)
    b2_p = jnp.tile(b2, pack).reshape(1, pack * h2).astype(jnp.float32)
    b3_p = jnp.tile(b3, pack).reshape(1, lanes).astype(jnp.float32)

    seed_arr = jnp.asarray([seed], dtype=jnp.int32)

    row_spec = pl.BlockSpec((tm, lanes), lambda i, s: (i, 0))
    full = lambda arr: pl.BlockSpec(arr.shape, lambda i, s: (0, 0))

    kernel = functools.partial(
        _gating_kernel, a=float(a), sigma=float(sigma),
        add_noise=bool(train_gates), use_hw_prng=bool(use_hw_prng),
        tm=tm, lanes=lanes)

    # ---- VMEM budget (double-buffered I/O blocks + fp32 activations + weights) ----
    side_bytes = jnp.dtype(side_dtype).itemsize
    itemsize = jnp.dtype(x.dtype).itemsize
    weight_bytes = int(wdt.itemsize * (w1_p.size + w2_p.size + w3_p.size)
                       + 4 * (b1_p.size + b2_p.size + b3_p.size))
    block_io = tm * lanes * (2 * itemsize + 2 * side_bytes)
    act_bytes = tm * pack * (h1 + h2 + 3 * embed) * 4
    vmem_est = 2 * block_io + act_bytes + 2 * weight_bytes
    vmem_limit = int(min(48 << 20, max(vmem_est + vmem_est // 2, 16 << 20)))

    cost = pl.CostEstimate(
        flops=int(2 * n_rows * (embed * h1 + h1 * h2 + h2 * embed)),
        transcendentals=0,
        bytes_accessed=int(n_rows * embed * (2 * itemsize + 2 * side_bytes)
                           + weight_bytes),
    )

    gated_p, gate_p, alpha_p = pl.pallas_call(
        kernel,
        out_shape=(
            jax.ShapeDtypeStruct((pr, lanes), x.dtype),
            jax.ShapeDtypeStruct((pr, lanes), side_dtype),
            jax.ShapeDtypeStruct((pr, lanes), side_dtype),
        ),
        grid_spec=pltpu.PrefetchScalarGridSpec(
            num_scalar_prefetch=1,
            grid=(grid_m,),
            in_specs=[
                row_spec,                              # x (lane-dense packed)
                full(w1_p), full(b1_p),
                full(w2_p), full(b2_p),
                full(w3_p), full(b3_p),
            ],
            out_specs=(row_spec, row_spec, row_spec),
        ),
        compiler_params=pltpu.CompilerParams(
            dimension_semantics=("parallel",),
            vmem_limit_bytes=vmem_limit),
        cost_estimate=cost,
    )(seed_arr, x_packed, w1_p, b1_p, w2_p, b2_p, w3_p, b3_p)

    def _unpack(y):
        y = y.reshape(pr * pack, embed)
        return y[:n_rows] if pad else y

    gated_x = _unpack(gated_p).reshape(batch, seq, feat_p_g, embed)
    gate = _unpack(gate_p).reshape(batch, seq * feat_p_g, embed)
    alpha = _unpack(alpha_p).reshape(batch, seq * feat_p_g, embed)
    return gated_x, gate, alpha


def init_params(key, input_dim, gating_hidden_dims=(64, 32)):
    """Deterministic init matching nn.Linear shapes (uniform +-1/sqrt(fan_in))."""
    dims = [input_dim] + list(gating_hidden_dims) + [input_dim]
    params = []
    for fan_in, fan_out in zip(dims[:-1], dims[1:]):
        key, kw, kb = jax.random.split(key, 3)
        bound = 1.0 / jnp.sqrt(fan_in)
        w = jax.random.uniform(kw, (fan_in, fan_out), jnp.float32, -bound, bound)
        b = jax.random.uniform(kb, (fan_out,), jnp.float32, -bound, bound)
        params += [w, b]
    return tuple(params)


if __name__ == "__main__":
    key = jax.random.PRNGKey(0)
    k_x, k_p, k_x2, k_x3 = jax.random.split(key, 4)

    batch, seq, feat_p_g, embed = 2, 8, 4, 32
    x = jax.random.normal(k_x, (batch, seq, feat_p_g, embed), jnp.float32)
    params = init_params(k_p, input_dim=embed, gating_hidden_dims=(64, 32))

    def reference(x, params, a=1.0):
        b, s, f, e = x.shape
        xf = x.reshape(b, s * f, e)
        w1, b1, w2, b2, w3, b3 = params
        h = jnp.maximum(xf @ w1 + b1, 0.0)
        h = jnp.maximum(h @ w2 + b2, 0.0)
        alpha = h @ w3 + b3
        gate = jnp.clip(a * alpha + 0.5, 0.0, 1.0)
        gated = (xf * gate).reshape(b, s, f, e)
        return gated, gate, alpha

    gated_r, gate_r, alpha_r = reference(x, params)

    # 1) exact-precision deterministic path (fp32 matmuls, fp32 side outputs)
    gated_d, gate_d, alpha_d = learned_feature_gating(
        x, params, train_gates=False,
        side_dtype=jnp.float32, matmul_dtype=jnp.float32)
    jax.block_until_ready((gated_d, gate_d, alpha_d))
    assert jnp.allclose(alpha_d, alpha_r, atol=1e-5)
    assert jnp.allclose(gate_d, gate_r, atol=1e-5)
    assert jnp.allclose(gated_d, gated_r, atol=1e-5)

    # 2) default fast path (bf16 matmul inputs + bf16 gate/alpha), deterministic
    gated_f, gate_f, alpha_f = learned_feature_gating(x, params, train_gates=False)
    jax.block_until_ready((gated_f, gate_f, alpha_f))
    assert jnp.allclose(alpha_f.astype(jnp.float32), alpha_r, atol=5e-2)
    assert jnp.allclose(gate_f.astype(jnp.float32), gate_r, atol=5e-2)
    assert jnp.allclose(gated_f, gated_r, atol=5e-2)

    # 3) stochastic path: alpha unaffected by noise, gate in [0,1],
    #    gated == x * gate, and the noise actually perturbs the gate.
    gated_n, gate_n, alpha_n = learned_feature_gating(x, params, seed=123,
                                                      train_gates=True)
    jax.block_until_ready((gated_n, gate_n, alpha_n))
    x_flat = x.reshape(batch, seq * feat_p_g, embed)
    gate_n32 = gate_n.astype(jnp.float32)
    assert jnp.allclose(alpha_n.astype(jnp.float32), alpha_r, atol=5e-2)
    assert bool(jnp.all(gate_n32 >= 0.0)) and bool(jnp.all(gate_n32 <= 1.0))
    assert jnp.allclose(gated_n.reshape(batch, seq * feat_p_g, embed),
                        x_flat * gate_n32, atol=5e-2)
    assert float(jnp.max(jnp.abs(gate_n32 - gate_f.astype(jnp.float32)))) > 1e-2

    # 4) ragged packed-row count (edge block masked in-kernel, no pad/slice copies)
    x2 = jax.random.normal(k_x2, (batch, seq, 3, embed), jnp.float32)
    gated_d2, gate_d2, alpha_d2 = learned_feature_gating(
        x2, params, train_gates=False,
        side_dtype=jnp.float32, matmul_dtype=jnp.float32)
    jax.block_until_ready((gated_d2, gate_d2, alpha_d2))
    gated_r2, gate_r2, alpha_r2 = reference(x2, params)
    assert jnp.allclose(alpha_d2, alpha_r2, atol=1e-5)
    assert jnp.allclose(gate_d2, gate_r2, atol=1e-5)
    assert jnp.allclose(gated_d2, gated_r2, atol=1e-5)

    # 5) row count not divisible by pack: exercises the tiny pack-pad path
    x3 = jax.random.normal(k_x3, (batch, 7, 3, embed), jnp.float32)
    gated_d3, gate_d3, alpha_d3 = learned_feature_gating(
        x3, params, train_gates=False,
        side_dtype=jnp.float32, matmul_dtype=jnp.float32)
    jax.block_until_ready((gated_d3, gate_d3, alpha_d3))
    gated_r3, gate_r3, alpha_r3 = reference(x3, params)
    assert jnp.allclose(alpha_d3, alpha_r3, atol=1e-5)
    assert jnp.allclose(gated_d3, gated_r3, atol=1e-5)

    print("KERNEL_OK")
</pallas_src>

<mosaic_0001>
module attributes {stable_mosaic.version = 11 : i64} {
  func.func @_gating_kernel(%arg0: i32, %arg1: memref<1xi32, #tpu.memory_space<smem>>, %arg2: memref<16x128xf32, #tpu.memory_space<vmem>>, %arg3: memref<128x256xf32, #tpu.memory_space<vmem>>, %arg4: memref<1x256xf32, #tpu.memory_space<vmem>>, %arg5: memref<256x128xf32, #tpu.memory_space<vmem>>, %arg6: memref<1x128xf32, #tpu.memory_space<vmem>>, %arg7: memref<128x128xf32, #tpu.memory_space<vmem>>, %arg8: memref<1x128xf32, #tpu.memory_space<vmem>>, %arg9: memref<16x128xf32, #tpu.memory_space<vmem>>, %arg10: memref<16x128xf32, #tpu.memory_space<vmem>>, %arg11: memref<16x128xf32, #tpu.memory_space<vmem>>) attributes {dimension_semantics = [#tpu.dimension_semantics<parallel>], iteration_bounds = array<i64: 1>, scalar_prefetch = 1 : i64, scratch_operands = 0 : i64, tpu.core_type = #tpu.core_type<tc>, window_params = [{transform_indices = @transform_0, window_bounds = array<i64: 16, 128>}, {pipeline_mode = #tpu.pipeline_mode<synchronous>, transform_indices = @transform_1, window_bounds = array<i64: 128, 256>}, {pipeline_mode = #tpu.pipeline_mode<synchronous>, transform_indices = @transform_2, window_bounds = array<i64: 1, 256>}, {pipeline_mode = #tpu.pipeline_mode<synchronous>, transform_indices = @transform_3, window_bounds = array<i64: 256, 128>}, {pipeline_mode = #tpu.pipeline_mode<synchronous>, transform_indices = @transform_4, window_bounds = array<i64: 1, 128>}, {pipeline_mode = #tpu.pipeline_mode<synchronous>, transform_indices = @transform_5, window_bounds = array<i64: 128, 128>}, {pipeline_mode = #tpu.pipeline_mode<synchronous>, transform_indices = @transform_6, window_bounds = array<i64: 1, 128>}, {transform_indices = @transform_7, window_bounds = array<i64: 16, 128>}, {transform_indices = @transform_8, window_bounds = array<i64: 16, 128>}, {transform_indices = @transform_9, window_bounds = array<i64: 16, 128>}]} {
    %c0 = arith.constant 0 : index
    %c0_0 = arith.constant 0 : index
    %0 = vector.load %arg2[%c0, %c0_0] : memref<16x128xf32, #tpu.memory_space<vmem>>, vector<16x128xf32>
    %c0_1 = arith.constant 0 : index
    %c0_2 = arith.constant 0 : index
    %1 = vector.load %arg3[%c0_1, %c0_2] : memref<128x256xf32, #tpu.memory_space<vmem>>, vector<128x256xf32>
    %cst = arith.constant dense<0.000000e+00> : vector<16x256xf32>
    %2 = tpu.matmul %0, %1, %cst {dimension_numbers = #tpu.dot_dimension_numbers<[1], [0], [0], [1], [0, 0, 1, 1], [], []>} : vector<16x128xf32>, vector<128x256xf32>, vector<16x256xf32> -> vector<16x256xf32>
    %c0_3 = arith.constant 0 : index
    %c0_4 = arith.constant 0 : index
    %3 = vector.load %arg4[%c0_3, %c0_4] : memref<1x256xf32, #tpu.memory_space<vmem>>, vector<1x256xf32>
    %4 = vector.broadcast %3 : vector<1x256xf32> to vector<16x256xf32>
    %5 = arith.addf %2, %4 : vector<16x256xf32>
    %cst_5 = arith.constant 0.000000e+00 : f32
    %6 = vector.broadcast %cst_5 : f32 to vector<16x256xf32>
    %7 = arith.maximumf %5, %6 : vector<16x256xf32>
    %c0_6 = arith.constant 0 : index
    %c0_7 = arith.constant 0 : index
    %8 = vector.load %arg5[%c0_6, %c0_7] : memref<256x128xf32, #tpu.memory_space<vmem>>, vector<256x128xf32>
    %cst_8 = arith.constant dense<0.000000e+00> : vector<16x128xf32>
    %9 = tpu.matmul %7, %8, %cst_8 {dimension_numbers = #tpu.dot_dimension_numbers<[1], [0], [0], [1], [0, 0, 1, 1], [], []>} : vector<16x256xf32>, vector<256x128xf32>, vector<16x128xf32> -> vector<16x128xf32>
    %c0_9 = arith.constant 0 : index
    %c0_10 = arith.constant 0 : index
    %10 = vector.load %arg6[%c0_9, %c0_10] : memref<1x128xf32, #tpu.memory_space<vmem>>, vector<1x128xf32>
    %11 = vector.broadcast %10 : vector<1x128xf32> to vector<16x128xf32>
    %12 = arith.addf %9, %11 : vector<16x128xf32>
    %cst_11 = arith.constant 0.000000e+00 : f32
    %13 = vector.broadcast %cst_11 : f32 to vector<16x128xf32>
    %14 = arith.maximumf %12, %13 : vector<16x128xf32>
    %c0_12 = arith.constant 0 : index
    %c0_13 = arith.constant 0 : index
    %15 = vector.load %arg7[%c0_12, %c0_13] : memref<128x128xf32, #tpu.memory_space<vmem>>, vector<128x128xf32>
    %cst_14 = arith.constant dense<0.000000e+00> : vector<16x128xf32>
    %16 = tpu.matmul %14, %15, %cst_14 {dimension_numbers = #tpu.dot_dimension_numbers<[1], [0], [0], [1], [0, 0, 1, 1], [], []>} : vector<16x128xf32>, vector<128x128xf32>, vector<16x128xf32> -> vector<16x128xf32>
    %c0_15 = arith.constant 0 : index
    %c0_16 = arith.constant 0 : index
    %17 = vector.load %arg8[%c0_15, %c0_16] : memref<1x128xf32, #tpu.memory_space<vmem>>, vector<1x128xf32>
    %18 = vector.broadcast %17 : vector<1x128xf32> to vector<16x128xf32>
    %19 = arith.addf %16, %18 : vector<16x128xf32>
    %cst_17 = arith.constant 1.000000e+00 : f32
    %20 = vector.broadcast %cst_17 : f32 to vector<16x128xf32>
    %21 = arith.mulf %20, %19 : vector<16x128xf32>
    %cst_18 = arith.constant 5.000000e-01 : f32
    %22 = vector.broadcast %cst_18 : f32 to vector<16x128xf32>
    %23 = arith.addf %21, %22 : vector<16x128xf32>
    %cst_19 = arith.constant 0.000000e+00 : f32
    %cst_20 = arith.constant 1.000000e+00 : f32
    %24 = vector.broadcast %cst_19 : f32 to vector<16x128xf32>
    %25 = arith.maximumf %24, %23 : vector<16x128xf32>
    %26 = vector.broadcast %cst_20 : f32 to vector<16x128xf32>
    %27 = arith.minimumf %26, %25 : vector<16x128xf32>
    %28 = arith.mulf %0, %27 : vector<16x128xf32>
    %c0_21 = arith.constant 0 : index
    %c0_22 = arith.constant 0 : index
    %29 = vector.load %arg9[%c0_21, %c0_22] : memref<16x128xf32, #tpu.memory_space<vmem>>, vector<16x128xf32>
    tpu.vector_store %arg9[%c0_21, %c0_22], %28 {strides = array<i32>} : memref<16x128xf32, #tpu.memory_space<vmem>>, vector<16x128xf32>,
    %c0_23 = arith.constant 0 : index
    %c0_24 = arith.constant 0 : index
    %30 = vector.load %arg10[%c0_23, %c0_24] : memref<16x128xf32, #tpu.memory_space<vmem>>, vector<16x128xf32>
    tpu.vector_store %arg10[%c0_23, %c0_24], %27 {strides = array<i32>} : memref<16x128xf32, #tpu.memory_space<vmem>>, vector<16x128xf32>,
    %c0_25 = arith.constant 0 : index
    %c0_26 = arith.constant 0 : index
    %31 = vector.load %arg11[%c0_25, %c0_26] : memref<16x128xf32, #tpu.memory_space<vmem>>, vector<16x128xf32>
    tpu.vector_store %arg11[%c0_25, %c0_26], %19 {strides = array<i32>} : memref<16x128xf32, #tpu.memory_space<vmem>>, vector<16x128xf32>,
    return
  }
  func.func @transform_0(%arg0: i32, %arg1: memref<1xi32, #tpu.memory_space<smem>>) -> (i32, i32) {
    %c0_i32 = arith.constant 0 : i32
    %c0_i32_0 = arith.constant 0 : i32
    return %arg0, %c0_i32 : i32, i32
  }
  func.func @transform_1(%arg0: i32, %arg1: memref<1xi32, #tpu.memory_space<smem>>) -> (i32, i32) {
    %c0_i32 = arith.constant 0 : i32
    %c0_i32_0 = arith.constant 0 : i32
    %c0_i32_1 = arith.constant 0 : i32
    return %c0_i32, %c0_i32_0 : i32, i32
  }
  func.func @transform_2(%arg0: i32, %arg1: memref<1xi32, #tpu.memory_space<smem>>) -> (i32, i32) {
    %c0_i32 = arith.constant 0 : i32
    %c0_i32_0 = arith.constant 0 : i32
    %c0_i32_1 = arith.constant 0 : i32
    return %c0_i32, %c0_i32_0 : i32, i32
  }
  func.func @transform_3(%arg0: i32, %arg1: memref<1xi32, #tpu.memory_space<smem>>) -> (i32, i32) {
    %c0_i32 = arith.constant 0 : i32
    %c0_i32_0 = arith.constant 0 : i32
    %c0_i32_1 = arith.constant 0 : i32
    return %c0_i32, %c0_i32_0 : i32, i32
  }
  func.func @transform_4(%arg0: i32, %arg1: memref<1xi32, #tpu.memory_space<smem>>) -> (i32, i32) {
    %c0_i32 = arith.constant 0 : i32
    %c0_i32_0 = arith.constant 0 : i32
    %c0_i32_1 = arith.constant 0 : i32
    return %c0_i32, %c0_i32_0 : i32, i32
  }
  func.func @transform_5(%arg0: i32, %arg1: memref<1xi32, #tpu.memory_space<smem>>) -> (i32, i32) {
    %c0_i32 = arith.constant 0 : i32
    %c0_i32_0 = arith.constant 0 : i32
    %c0_i32_1 = arith.constant 0 : i32
    return %c0_i32, %c0_i32_0 : i32, i32
  }
  func.func @transform_6(%arg0: i32, %arg1: memref<1xi32, #tpu.memory_space<smem>>) -> (i32, i32) {
    %c0_i32 = arith.constant 0 : i32
    %c0_i32_0 = arith.constant 0 : i32
    %c0_i32_1 = arith.constant 0 : i32
    return %c0_i32, %c0_i32_0 : i32, i32
  }
  func.func @transform_7(%arg0: i32, %arg1: memref<1xi32, #tpu.memory_space<smem>>) -> (i32, i32) {
    %c0_i32 = arith.constant 0 : i32
    %c0_i32_0 = arith.constant 0 : i32
    return %arg0, %c0_i32 : i32, i32
  }
  func.func @transform_8(%arg0: i32, %arg1: memref<1xi32, #tpu.memory_space<smem>>) -> (i32, i32) {
    %c0_i32 = arith.constant 0 : i32
    %c0_i32_0 = arith.constant 0 : i32
    return %arg0, %c0_i32 : i32, i32
  }
  func.func @transform_9(%arg0: i32, %arg1: memref<1xi32, #tpu.memory_space<smem>>) -> (i32, i32) {
    %c0_i32 = arith.constant 0 : i32
    %c0_i32_0 = arith.constant 0 : i32
    return %arg0, %c0_i32 : i32, i32
  }
}

</mosaic_0001>

<bundles_post_ra>
// kernel: tpu_custom_call.1
= control target key start
LH: loop header
LB: loop body
LE: loop exit
PB: predicated region body
PF: predicated region fallthrough
CT: control target
= control target key end

     0   :  { %17 = vsyncpa [#allocation5], 0  ;;  %s1067_s0 = inlined_call_operand.<no memory space> [shape: s32[1], index: 0, kind: input, shape index: {}]   ;;  %s1068_s1 = inlined_call_operand.hbm [shape: f32[16,128], index: 1, kind: input, shape index: {}]   ;;  %s1069_s2 = inlined_call_operand.hbm [shape: f32[128,256], index: 2, kind: input, shape index: {}]   ;;  %s1070_s3 = inlined_call_operand.vmem [shape: f32[1,256], index: 3, kind: input, shape index: {}]   ;;  %s1071_s4 = inlined_call_operand.hbm [shape: f32[256,128], index: 4, kind: input, shape index: {}]   ;;  %s1072_s5 = inlined_call_operand.vmem [shape: f32[1,128], index: 5, kind: input, shape index: {}]   ;;  %s1073_s6 = inlined_call_operand.hbm [shape: f32[128,128], index: 6, kind: input, shape index: {}]   ;;  %s1074_s7 = inlined_call_operand.vmem [shape: f32[1,128], index: 7, kind: input, shape index: {}]   ;;  %s1075_s8 = inlined_call_operand.hbm [shape: f32[16,128], index: 8, kind: output, shape index: {0}]   ;;  %s1076_s9 = inlined_call_operand.hbm [shape: f32[16,128], index: 9, kind: output, shape index: {1}]   ;;  %s1077_s10 = inlined_call_operand.hbm [shape: f32[16,128], index: 10, kind: output, shape index: {2}]  }
   0x1   :  { %18 = vsyncpa [#allocation8], 0 }
   0x2   :  { %19 = vsyncpa [#allocation11], 0 }
   0x3   :  { %20 = vsyncpa [#allocation6], 0 }
   0x4   :  { %21 = vsyncpa [#allocation14], 0  ;;  %s858_s12 = smov [#allocation7]   ;;  %s694_s16 = scalar_lea.hbm %s1069_s2, 4096 }
   0x5   :  { %s39_s13 = sshll.u32 %s858_s12, 4  ;;  %p695_p0 = scmp.ne.s32.totalorder %s1069_s2, %s694_s16  ;;  %s40_s13 = int_to_ptr.vmem [resolvable:$true] %s39_s13 }
   0x6   :  { %p698_p1 = scmp.lt.u32.totalorder %s694_s16, %s1069_s2 }
   0x8   :  { %p700_p2 = pnand %p698_p1, %p695_p0 }
   0xa   :  { %703 = shalt.err (!%p700_p2)
}
   0xb   :  { %s704_s21 = scalar_lea.vmem %s40_s13, 4096  ;;  %p709_p4 = scmp.lt.s32.totalorder %s40_s13, %s40_s13 }
   0xc   :  { %p705_p3 = scmp.ne.s32.totalorder %s40_s13, %s704_s21  ;;  %p710_p5 = scmp.lt.s32.totalorder %s704_s21, %s704_s21 }
   0xe   :  { %p711_p6 = por %p710_p5, %p709_p4 }
  0x10   :  { %p712_p7 = pnand %p711_p6, %p705_p3 }
  0x12   :  { %715 = shalt.err (!%p712_p7)
}
  0x13   :  { %s859_s22 = smov 256   ;;  %s860_s23 = smov 16  }
  0x14   :  { %45 = dma.hbm_to_vmem [thread:$0]  %s1069_s2, 4096, %s40_s13, [#allocation8], %s859_s22, %s859_s22, %s860_s23  }
  0x15   :  { %s861_s0 = smov [#allocation4]   ;;  %s716_s29 = scalar_lea.hbm %s1068_s1, 256 }
  0x16   :  { %s27_s26 = sshll.u32 %s861_s0, 4  ;;  %p717_p8 = scmp.ne.s32.totalorder %s1068_s1, %s716_s29  ;;  %s28_s26 = int_to_ptr.vmem [resolvable:$true] %s27_s26 }
  0x17   :  { %p720_p9 = scmp.lt.u32.totalorder %s716_s29, %s1068_s1 }
  0x19   :  { %p722_p10 = pnand %p720_p9, %p717_p8 }
  0x1b   :  { %725 = shalt.err (!%p722_p10)
}
  0x1c   :  { %s726_s15 = scalar_lea.vmem %s28_s26, 256  ;;  %p731_p12 = scmp.lt.s32.totalorder %s28_s26, %s28_s26 }
  0x1d   :  { %p727_p11 = scmp.ne.s32.totalorder %s28_s26, %s726_s15  ;;  %p732_p13 = scmp.lt.s32.totalorder %s726_s15, %s726_s15 }
  0x1f   :  { %p733_p0 = por %p732_p13, %p731_p12 }
  0x21   :  { %p734_p1 = pnand %p733_p0, %p727_p11 }
  0x23   :  { %737 = shalt.err (!%p734_p1)
}
  0x24   :  { %s862_s2 = smov 128   ;;  %s863_s13 = smov 8  }
  0x25   :  { %33 = dma.hbm_to_vmem [thread:$0]  %s1068_s1, 256, %s28_s26, [#allocation5], %s862_s2, %s862_s2, %s863_s13  }
  0x26   :  { %s864_s18 = smov [#allocation9]   ;;  %s865_s20 = smov [#allocation10]  }
  0x27   :  { %s53_s19 = sshll.u32 %s864_s18, 4  ;;  %s67_s21 = sshll.u32 %s865_s20, 4  ;;  %s54_s19 = int_to_ptr.vmem [resolvable:$true] %s53_s19  ;;  %s952_s21 = int_to_ptr.vmem [resolvable:$true] %s67_s21 }
  0x28   :  { %s738_s24 = scalar_lea.hbm %s1071_s4, 4096 }
  0x29   :  { %p739_p2 = scmp.ne.s32.totalorder %s1071_s4, %s738_s24  ;;  %p742_p3 = scmp.lt.u32.totalorder %s738_s24, %s1071_s4 }
  0x2b   :  { %p744_p4 = pnand %p742_p3, %p739_p2 }
  0x2d   :  { %747 = shalt.err (!%p744_p4)
}
  0x2e   :  { %s748_s1 = scalar_lea.vmem %s54_s19, 4096  ;;  %p753_p6 = scmp.lt.s32.totalorder %s54_s19, %s54_s19 }
  0x2f   :  { %p749_p5 = scmp.ne.s32.totalorder %s54_s19, %s748_s1  ;;  %p754_p7 = scmp.lt.s32.totalorder %s748_s1, %s748_s1 }
  0x31   :  { %p755_p8 = por %p754_p7, %p753_p6 }
  0x33   :  { %p756_p9 = pnand %p755_p8, %p749_p5 }
  0x35   :  { %759 = shalt.err (!%p756_p9)
}
  0x36   :  { %59 = dma.hbm_to_vmem [thread:$0]  %s1071_s4, 4096, %s54_s19, [#allocation8], %s862_s2, %s862_s2, %s863_s13  }
  0x37   :  { %s760_s12 = scalar_lea.hbm %s1073_s6, 2048 }
  0x38   :  { %p761_p10 = scmp.ne.s32.totalorder %s1073_s6, %s760_s12  ;;  %p764_p11 = scmp.lt.u32.totalorder %s760_s12, %s1073_s6 }
  0x3a   :  { %p766_p12 = pnand %p764_p11, %p761_p10 }
  0x3c   :  { %769 = shalt.err (!%p766_p12)
}
  0x3d   :  { %s770_s18 = scalar_lea.vmem %s952_s21, 2048  ;;  %p775_p0 = scmp.lt.s32.totalorder %s952_s21, %s952_s21 }
  0x3e   :  { %p771_p13 = scmp.ne.s32.totalorder %s952_s21, %s770_s18  ;;  %p776_p1 = scmp.lt.s32.totalorder %s770_s18, %s770_s18 }
  0x40   :  { %p777_p2 = por %p776_p1, %p775_p0 }
  0x42   :  { %p778_p3 = pnand %p777_p2, %p771_p13 }
  0x44   :  { %781 = shalt.err (!%p778_p3)
}
  0x45   :  { %73 = dma.hbm_to_vmem [thread:$0]  %s1073_s6, 2048, %s952_s21, [#allocation11], %s862_s2, %s862_s2, %s863_s13  }
  0x46   :  { %848 = dma.done.wait [#allocation5], 256  }
  0x47   :  { %849 = vsyncadd [#allocation5], 4294967040 }
  0x48   :  { %850 = dma.done.wait [#allocation8], 8192  }
  0x49   :  { %851 = vsyncadd [#allocation8], 4294959104 }
  0x4a   :  { %852 = dma.done.wait [#allocation11], 2048  }
  0x4b   :  { %853 = vsyncadd [#allocation11], 4294965248  ;;  %v866_v0 = vmov 0.0   ;;  %v91_v1 = vld [vmem:[#allocation7 + $0x8] sm:$0xff]  ;;  %v93_v2 = vld [vmem:[#allocation7 + $0x18] sm:$0xff]  ;;  %s868_s25 = smov [#allocation15]  }
  0x4c   :  { %198 = vmatprep.mubr.f32.mxu0 %v866_v0  ;;  %v90_v3 = vld [vmem:[#allocation7] sm:$0xff]  ;;  %v586_v4 = vpack.c.bf16 %v93_v2, %v91_v1  ;;  %v92_v5 = vld [vmem:[#allocation7 + $0x10] sm:$0xff]  ;;  %v95_v6 = vld [vmem:[#allocation7 + $0x28] sm:$0xff]  ;;  %s472_s0 = sshll.u32 %s868_s25, 4  ;;  %s869_s27 = smov [#allocation12]   ;;  %s1007_s0 = int_to_ptr.vmem [resolvable:$true] %s472_s0 }
  0x4d   :  { %v97_v7 = vld [vmem:[#allocation7 + $0x38] sm:$0xff]  ;;  %v588_v8 = vpack.c.bf16 %v92_v5, %v90_v3  ;;  %v94_v10 = vld [vmem:[#allocation7 + $0x20] sm:$0xff]  ;;  %v96_v11 = vld [vmem:[#allocation7 + $0x30] sm:$0xff]  ;;  %s448_s28 = sshll.u32 %s869_s27, 4  ;;  %s1010_s28 = int_to_ptr.vmem [resolvable:$true] %s448_s28 }
  0x4e   :  { %v590_v9 = vpack.c.bf16 %v97_v7, %v95_v6  ;;  %v99_v12 = vld [vmem:[#allocation7 + $0x48] sm:$0xff]  ;;  %587 = vmatprep.subr.bf16.mxu0 %v586_v4  ;;  %v101_v13 = vld [vmem:[#allocation7 + $0x58] sm:$0xff]  ;;  %v592_v14 = vpack.c.bf16 %v96_v11, %v94_v10  ;;  %v98_v16 = vld [vmem:[#allocation7 + $0x40] sm:$0xff] }
  0x4f   :  { %589 = vmatpush1.bf16.msra.mxu0 %v588_v8  ;;  %v594_v15 = vpack.c.bf16 %v101_v13, %v99_v12  ;;  %v100_v17 = vld [vmem:[#allocation7 + $0x50] sm:$0xff]  ;;  %v103_v18 = vld [vmem:[#allocation7 + $0x68] sm:$0xff]  ;;  %v105_v19 = vld [vmem:[#allocation7 + $0x78] sm:$0xff] }
  0x50   :  { %591 = vmatprep.subr.bf16.mxu0 %v590_v9  ;;  %v596_v20 = vpack.c.bf16 %v100_v17, %v98_v16  ;;  %v598_v21 = vpack.c.bf16 %v105_v19, %v103_v18  ;;  %v102_v22 = vld [vmem:[#allocation7 + $0x60] sm:$0xff]  ;;  %v104_v23 = vld [vmem:[#allocation7 + $0x70] sm:$0xff]  ;;  %v107_v24 = vld [vmem:[#allocation7 + $0x88] sm:$0xff] }
  0x51   :  { %v109_v25 = vld [vmem:[#allocation7 + $0x98] sm:$0xff]  ;;  %v106_v26 = vld [vmem:[#allocation7 + $0x80] sm:$0xff]  ;;  %v108_v27 = vld [vmem:[#allocation7 + $0x90] sm:$0xff]  ;;  %v600_v30 = vpack.c.bf16 %v104_v23, %v102_v22 }
  0x52   :  { %v231_v28 = vld [vmem:[#allocation9 + $0x80] sm:$0xff]  ;;  %v232_v29 = vld [vmem:[#allocation9 + $0x88] sm:$0xff]  ;;  %v233_v35 = vld [vmem:[#allocation9 + $0x90] sm:$0xff]  ;;  %v602_v36 = vpack.c.bf16 %v109_v25, %v107_v24  ;;  %v604_v46 = vpack.c.bf16 %v108_v27, %v106_v26 }
  0x53   :  { %593 = vmatpush1.bf16.msra.mxu0 %v592_v14  ;;  %v111_v31 = vld [vmem:[#allocation7 + $0xa8] sm:$0xff]  ;;  %v618_v32 = vpack.c.bf16 %v232_v29, %v231_v28  ;;  %v215_v33 = vld [vmem:[#allocation9] sm:$0xff]  ;;  %v234_v38 = vld [vmem:[#allocation9 + $0x98] sm:$0xff] }
  0x54   :  { %595 = vmatprep.subr.bf16.mxu0 %v594_v15  ;;  %v216_v34 = vld [vmem:[#allocation9 + $0x8] sm:$0xff]  ;;  %v217_v39 = vld [vmem:[#allocation9 + $0x10] sm:$0xff]  ;;  %v218_v40 = vld [vmem:[#allocation9 + $0x18] sm:$0xff]  ;;  %v622_v42 = vpack.c.bf16 %v234_v38, %v233_v35 }
  0x55   :  { %v620_v37 = vpack.c.bf16 %v216_v34, %v215_v33  ;;  %v113_v41 = vld [vmem:[#allocation7 + $0xb8] sm:$0xff]  ;;  %619 = vmatprep.subr.bf16.mxu1 %v618_v32  ;;  %v235_v43 = vld [vmem:[#allocation9 + $0xa0] sm:$0xff]  ;;  %v236_v44 = vld [vmem:[#allocation9 + $0xa8] sm:$0xff]  ;;  %v624_v45 = vpack.c.bf16 %v218_v40, %v217_v39 }
  0x56   :  { %v110_v47 = vld [vmem:[#allocation7 + $0xa0] sm:$0xff]  ;;  %v626_v48 = vpack.c.bf16 %v236_v44, %v235_v43  ;;  %v220_v50 = vld [vmem:[#allocation9 + $0x28] sm:$0xff]  ;;  %v606_v51 = vpack.c.bf16 %v113_v41, %v111_v31  ;;  %v112_v52 = vld [vmem:[#allocation7 + $0xb0] sm:$0xff] }
  0x57   :  { %597 = vmatpush1.bf16.msra.mxu0 %v596_v20  ;;  %621 = vmatpush3.bf16.msra.mxu1 %v620_v37  ;;  %v219_v49 = vld [vmem:[#allocation9 + $0x20] sm:$0xff]  ;;  %v237_v53 = vld [vmem:[#allocation9 + $0xb0] sm:$0xff]  ;;  %v238_v54 = vld [vmem:[#allocation9 + $0xb8] sm:$0xff]  ;;  %v608_v58 = vpack.c.bf16 %v112_v52, %v110_v47 }
  0x58   :  { %599 = vmatprep.subr.bf16.mxu0 %v598_v21  ;;  %623 = vmatprep.subr.bf16.mxu1 %v622_v42  ;;  %v115_v55 = vld [vmem:[#allocation7 + $0xc8] sm:$0xff]  ;;  %v117_v56 = vld [vmem:[#allocation7 + $0xd8] sm:$0xff]  ;;  %v628_v57 = vpack.c.bf16 %v220_v50, %v219_v49  ;;  %v114_v59 = vld [vmem:[#allocation7 + $0xc0] sm:$0xff]  ;;  %v630_v60 = vpack.c.bf16 %v238_v54, %v237_v53  ;;  %v124_v50 = vlaneseq }
  0x59   :  { %v221_v61 = vld [vmem:[#allocation9 + $0x30] sm:$0xff]  ;;  %v222_v62 = vld [vmem:[#allocation9 + $0x38] sm:$0xff]  ;;  %v610_v63 = vpack.c.bf16 %v117_v56, %v115_v55  ;;  %v239_v2 = vld [vmem:[#allocation9 + $0xc0] sm:$0xff] }
  0x5a   :  { %v116_v1 = vld [vmem:[#allocation7 + $0xd0] sm:$0xff]  ;;  %v240_v3 = vld [vmem:[#allocation9 + $0xc8] sm:$0xff]  ;;  %v121_v5 = vld [vmem:[#allocation7 + $0xf8] sm:$0xff]  ;;  %v632_v6 = vpack.c.bf16 %v222_v62, %v221_v61 }
  0x5b   :  { %601 = vmatpush1.bf16.msra.mxu0 %v600_v30  ;;  %625 = vmatpush3.bf16.msra.mxu1 %v624_v45  ;;  %v119_v4 = vld [vmem:[#allocation7 + $0xe8] sm:$0xff]  ;;  %v612_v7 = vpack.c.bf16 %v116_v1, %v114_v59  ;;  %v118_v8 = vld [vmem:[#allocation7 + $0xe0] sm:$0xff]  ;;  %v634_v9 = vpack.c.bf16 %v240_v3, %v239_v2  ;;  %v120_v13 = vld [vmem:[#allocation7 + $0xf0] sm:$0xff] }
  0x5c   :  { %603 = vmatprep.subr.bf16.mxu0 %v602_v36  ;;  %627 = vmatprep.subr.bf16.mxu1 %v626_v48  ;;  %v223_v10 = vld [vmem:[#allocation9 + $0x40] sm:$0xff]  ;;  %v224_v11 = vld [vmem:[#allocation9 + $0x48] sm:$0xff]  ;;  %v614_v12 = vpack.c.bf16 %v121_v5, %v119_v4  ;;  %v241_v14 = vld [vmem:[#allocation9 + $0xd0] sm:$0xff]  ;;  %v616_v17 = vpack.c.bf16 %v120_v13, %v118_v8 }
  0x5d   :  { %v242_v15 = vld [vmem:[#allocation9 + $0xd8] sm:$0xff]  ;;  %v636_v16 = vpack.c.bf16 %v224_v11, %v223_v10  ;;  %v225_v19 = vld [vmem:[#allocation9 + $0x50] sm:$0xff]  ;;  %v243_v21 = vld [vmem:[#allocation9 + $0xe0] sm:$0xff] }
  0x5e   :  { %v638_v18 = vpack.c.bf16 %v242_v15, %v241_v14  ;;  %v226_v20 = vld [vmem:[#allocation9 + $0x58] sm:$0xff]  ;;  %v244_v22 = vld [vmem:[#allocation9 + $0xe8] sm:$0xff]  ;;  %v990_v24 = vld [vmem:[#allocation4] sm:$0xff] }
  0x5f   :  { %605 = vmatpush1.bf16.msra.mxu0 %v604_v46  ;;  %629 = vmatpush3.bf16.msra.mxu1 %v628_v57  ;;  %v640_v23 = vpack.c.bf16 %v226_v20, %v225_v19  ;;  %v642_v25 = vpack.c.bf16 %v244_v22, %v243_v21  ;;  %v994_v26 = vld [vmem:[#allocation4 + $0x8] sm:$0xff]  ;;  %v227_v27 = vld [vmem:[#allocation9 + $0x60] sm:$0xff]  ;;  %v228_v28 = vld [vmem:[#allocation9 + $0x68] sm:$0xff] }
  0x60   :  { %607 = vmatprep.subr.bf16.mxu0 %v606_v51  ;;  %631 = vmatprep.subr.bf16.mxu1 %v630_v60  ;;  %v644_v29 = vpack.c.bf16 %v228_v28, %v227_v27  ;;  %v245_v30 = vld [vmem:[#allocation9 + $0xf0] sm:$0xff]  ;;  %v246_v31 = vld [vmem:[#allocation9 + $0xf8] sm:$0xff]  ;;  %v331_v36 = vld [vmem:[#allocation10] sm:$0xff]  ;;  %v125_v51 = vshrl.u32 %v124_v50, 7 }
  0x61   :  { %v646_v32 = vpack.c.bf16 %v246_v31, %v245_v30  ;;  %v229_v33 = vld [vmem:[#allocation9 + $0x70] sm:$0xff]  ;;  %v230_v34 = vld [vmem:[#allocation9 + $0x78] sm:$0xff]  ;;  %v332_v37 = vld [vmem:[#allocation10 + $0x8] sm:$0xff] }
  0x62   :  { %v648_v35 = vpack.c.bf16 %v230_v34, %v229_v33  ;;  %v650_v38 = vpack.c.bf16 %v332_v37, %v331_v36  ;;  %v334_v39 = vld [vmem:[#allocation10 + $0x18] sm:$0xff]  ;;  %v335_v41 = vld [vmem:[#allocation10 + $0x20] sm:$0xff]  ;;  %v336_v42 = vld [vmem:[#allocation10 + $0x28] sm:$0xff]  ;;  %v126_v52 = vsub.s32 0, %v125_v51  ;;  %v130_v54 = vsub.s32 1, %v125_v51 }
  0x63   :  { %609 = vmatpush1.bf16.msra.mxu0 %v608_v58  ;;  %633 = vmatpush3.bf16.msra.mxu1 %v632_v6  ;;  %v658_v43 = vpack.c.bf16 %v336_v42, %v335_v41  ;;  %v337_v44 = vld [vmem:[#allocation10 + $0x30] sm:$0xff]  ;;  %v338_v45 = vld [vmem:[#allocation10 + $0x38] sm:$0xff]  ;;  %v339_v47 = vld [vmem:[#allocation10 + $0x40] sm:$0xff] }
  0x64   :  { %611 = vmatprep.subr.bf16.mxu0 %v610_v63  ;;  %635 = vmatprep.subr.bf16.mxu1 %v634_v9  ;;  %v662_v46 = vpack.c.bf16 %v338_v45, %v337_v44  ;;  %v340_v48 = vld [vmem:[#allocation10 + $0x48] sm:$0xff]  ;;  %v122_v53 = vld [vmem:[%s1070_s3] sm:$0x3]  ;;  %v343_v9 = vld [vmem:[#allocation10 + $0x60] sm:$0xff] }
  0x65   :  { %v666_v49 = vpack.c.bf16 %v340_v48, %v339_v47  ;;  %v127_v55 = vrot.slane %v122_v53, %v126_v52  ;;  %v131_v56 = vrot.slane %v122_v53, %v130_v54  ;;  %v341_v6 = vld [vmem:[#allocation10 + $0x50] sm:$0xff]  ;;  %v344_v10 = vld [vmem:[#allocation10 + $0x68] sm:$0xff]  ;;  %v346_v13 = vld [vmem:[#allocation10 + $0x78] sm:$0xff] }
  0x66   :  { %v674_v11 = vpack.c.bf16 %v344_v10, %v343_v9  ;;  %v494_v28 = vld [vmem:[%s1074_s7] ss:$0 sm:$0xff] }
  0x67   :  { %613 = vmatpush1.bf16.msra.mxu0 %v612_v7  ;;  %637 = vmatpush3.bf16.msra.mxu1 %v636_v16  ;;  %v342_v7 = vld [vmem:[#allocation10 + $0x58] sm:$0xff]  ;;  %v493_v16 = vld [vmem:[%s1072_s5] ss:$0 sm:$0xff]  ;;  %s867_s5 = smov [#allocation13]  }
  0x68   :  { %615 = vmatprep.subr.bf16.mxu0 %v614_v12  ;;  %639 = vmatprep.subr.bf16.mxu1 %v638_v18  ;;  %v670_v8 = vpack.c.bf16 %v342_v7, %v341_v6  ;;  %v345_v12 = vld [vmem:[#allocation10 + $0x70] sm:$0xff]  ;;  %s460_s24 = sshll.u32 %s867_s5, 4  ;;  %s461_s24 = int_to_ptr.vmem [resolvable:$true] %s460_s24 }
  0x69   :  { %v678_v14 = vpack.c.bf16 %v346_v13, %v345_v12  ;;  %s782_s7 = scalar_lea.vmem %s461_s24, 256  ;;  %p787_p5 = scmp.lt.s32.totalorder %s461_s24, %s461_s24 }
  0x6a   :  { %p783_p4 = scmp.ne.s32.totalorder %s461_s24, %s782_s7  ;;  %p788_p6 = scmp.lt.s32.totalorder %s782_s7, %s782_s7 }
  0x6b   :  { %617 = vmatpush1.bf16.msra.mxu0 %v616_v17  ;;  %641 = vmatpush3.bf16.msra.mxu1 %v640_v23 }
  0x6c   :  { %643 = vmatprep.subr.bf16.mxu1 %v642_v25  ;;  %651 = vmatprep.subr.bf16.mxu0 %v650_v38  ;;  %p789_p7 = por %p788_p6, %p787_p5 }
  0x6e   :  { %199 = vmatmul.mubr.f32.vlgmr.msra.gmra.mrb[0].mxu0 %v990_v24  ;;  %p790_p8 = pnand %p789_p7, %p783_p4 }
  0x6f   :  { %204 = vmatprep.mubr.f32.mxu0 %v866_v0  ;;  %645 = vmatpush3.bf16.msra.mxu1 %v644_v29  ;;  %v333_v0 = vld [vmem:[#allocation10 + $0x10] sm:$0xff] }
  0x70   :  { %647 = vmatprep.subr.bf16.mxu1 %v646_v32  ;;  %v654_v40 = vpack.c.bf16 %v334_v39, %v333_v0  ;;  %653 = vmatpush3.bf16.msra.mxu0 %v650_v38 }
  0x72   :  { %205 = vmatmul.mubr.f32.gmra.mrb[2].mxu0 %v994_v26  ;;  %655 = vmatprep.subr.bf16.mxu0 %v654_v40 }
  0x73   :  { %649 = vmatpush3.bf16.msra.mxu1 %v648_v35 }
  0x74   :  { %657 = vmatpush3.bf16.msra.mxu0 %v654_v40 }
  0x75   :  { %659 = vmatprep.subr.bf16.mxu0 %v658_v43 }
  0x78   :  { %661 = vmatpush3.bf16.msra.mxu0 %v658_v43 }
  0x79   :  { %663 = vmatprep.subr.bf16.mxu0 %v662_v46 }
  0x7c   :  { %665 = vmatpush3.bf16.msra.mxu0 %v662_v46 }
  0x7d   :  { %667 = vmatprep.subr.bf16.mxu0 %v666_v49 }
  0x80   :  { %669 = vmatpush3.bf16.msra.mxu0 %v666_v49 }
  0x81   :  { %671 = vmatprep.subr.bf16.mxu0 %v670_v8 }
  0x84   :  { %673 = vmatpush3.bf16.msra.mxu0 %v670_v8 }
  0x85   :  { %675 = vmatprep.subr.bf16.mxu0 %v674_v11 }
  0x88   :  { %677 = vmatpush3.bf16.msra.mxu0 %v674_v11 }
  0x89   :  { %679 = vmatprep.subr.bf16.mxu0 %v678_v14 }
  0x8c   :  { %681 = vmatpush3.bf16.msra.mxu0 %v678_v14 }
 0x141   :  { %v200_v57 = vpop.f32.mrb[0].mxu0 }
 0x142   :  { %v201_v58 = vadd.f32 %v200_v57, %v127_v55  ;;  %v202_v59 = vpop.f32.mrb[1].mxu0 }
 0x143   :  { %v203_v60 = vadd.f32 %v202_v59, %v131_v56 }
 0x144   :  { %v211_v63 = vmax.f32 %v201_v58, 0.0 }
 0x145   :  { %v206_v61 = vpop.f32.mrb[2].mxu0  ;;  %v212_v62 = vmax.f32 %v203_v60, 0.0 }
 0x146   :  { %v207_v1 = vadd.f32 %v206_v61, %v127_v55  ;;  %v208_v2 = vpop.f32.mrb[3].mxu0 }
 0x147   :  { %v209_v3 = vadd.f32 %v208_v2, %v131_v56  ;;  %318 = vmatprep.mubr.f32.mxu1 %v212_v62 }
 0x148   :  { %319 = vmatmul.mubr.f32.vlgmr.msra.gmra.mrb[0].mxu1 %v211_v63  ;;  %v213_v5 = vmax.f32 %v207_v1, 0.0 }
 0x149   :  { %v214_v4 = vmax.f32 %v209_v3, 0.0 }
 0x14b   :  { %323 = vmatprep.mubr.f32.mxu1 %v214_v4 }
 0x14c   :  { %324 = vmatmul.mubr.f32.gmra.mrb[2].mxu1 %v213_v5 }
 0x21b   :  { %v527_v15 = vpop.f32.mrb[0].mxu1 }
 0x21c   :  { %v528_v17 = vpop.f32.mrb[1].mxu1 }
 0x21d   :  { %v529_v18 = vadd.f32 %v528_v17, %v527_v15 }
 0x21f   :  { %v321_v19 = vadd.f32 %v529_v18, %v493_v16  ;;  %v530_v20 = vpop.f32.mrb[2].mxu1 }
 0x220   :  { %v531_v21 = vpop.f32.mrb[3].mxu1 }
 0x221   :  { %v329_v22 = vmax.f32 %v321_v19, 0.0  ;;  %v532_v23 = vadd.f32 %v531_v21, %v530_v20 }
 0x223   :  { %v326_v25 = vadd.f32 %v532_v23, %v493_v16  ;;  %583 = vmatprep.mubr.f32.mxu0 %v329_v22 }
 0x225   :  { %v330_v27 = vmax.f32 %v326_v25, 0.0 }
 0x227   :  { %584 = vmatmul.mubr.f32.vlgmr.msra.gmra.mrb[4].mxu0 %v330_v27 }
 0x2fa   :  { %v585_v29 = vpop.f32.mrb[4].mxu0 }
 0x2fb   :  { %v426_v30 = vadd.f32 %v585_v29, %v494_v28  ;;  %v420_v31 = vpop.f32.mrb[5].mxu0 }
 0x2fc   :  { %v421_v32 = vadd.f32 %v494_v28, %v420_v31 }
 0x2fd   :  { %v430_v33 = vadd.f32 0.5, %v426_v30  ;;  %442 = vst [vmem:[#allocation15 + $0x8] sm:$0xff] %v426_v30 }
 0x2fe   :  { %v429_v34 = vadd.f32 0.5, %v421_v32  ;;  %441 = vst [vmem:[#allocation15] sm:$0xff] %v421_v32 }
 0x2ff   :  { %v432_v35 = vmax.f32 %v430_v33, 0.0 }
 0x300   :  { %v431_v36 = vmax.f32 %v429_v34, 0.0 }
 0x301   :  { %v434_v37 = vmin.f32 %v432_v35, 1.0 }
 0x302   :  { %v433_v0 = vmin.f32 %v431_v36, 1.0 }
 0x303   :  { %440 = vst [vmem:[#allocation13 + $0x8] sm:$0xff] %v434_v37  ;;  %v436_v38 = vmul.f32 %v434_v37, %v994_v26 }
 0x304   :  { %439 = vst [vmem:[#allocation13] sm:$0xff] %v433_v0  ;;  %v435_v39 = vmul.f32 %v433_v0, %v990_v24 }
 0x305   :  { %793 = shalt.err (!%p790_p8)
}
 0x306   :  { %s794_s29 = scalar_lea.hbm %s1076_s9, 256 }
 0x307   :  { %p795_p9 = scmp.ne.s32.totalorder %s1076_s9, %s794_s29  ;;  %p798_p10 = scmp.lt.u32.totalorder %s794_s29, %s1076_s9 }
 0x309   :  { %p800_p11 = pnand %p798_p10, %p795_p9 }
 0x30b   :  { %803 = shalt.err (!%p800_p11)
}
 0x30c   :  { %466 = dma.vmem_to_hbm [thread:$0]  %s461_s24, 256, %s1076_s9, [#allocation14], %s862_s2, %s862_s2, %s863_s13   ;;  %438 = vst [vmem:[#allocation12 + $0x8] sm:$0xff] %v436_v38  ;;  %437 = vst [vmem:[#allocation12] sm:$0xff] %v435_v39 }
 0x30d   :  { %s804_s17 = scalar_lea.vmem %s1007_s0, 256  ;;  %p809_p13 = scmp.lt.s32.totalorder %s1007_s0, %s1007_s0 }
 0x30e   :  { %p805_p12 = scmp.ne.s32.totalorder %s1007_s0, %s804_s17  ;;  %p810_p0 = scmp.lt.s32.totalorder %s804_s17, %s804_s17 }
 0x310   :  { %p811_p1 = por %p810_p0, %p809_p13 }
 0x312   :  { %p812_p2 = pnand %p811_p1, %p805_p12 }
 0x314   :  { %815 = shalt.err (!%p812_p2)
}
 0x315   :  { %s816_s19 = scalar_lea.hbm %s1077_s10, 256 }
 0x316   :  { %p817_p3 = scmp.ne.s32.totalorder %s1077_s10, %s816_s19  ;;  %p820_p4 = scmp.lt.u32.totalorder %s816_s19, %s1077_s10 }
 0x318   :  { %p822_p5 = pnand %p820_p4, %p817_p3 }
 0x31a   :  { %825 = shalt.err (!%p822_p5)
}
 0x31b   :  { %478 = dma.vmem_to_hbm [thread:$0]  %s1007_s0, 256, %s1077_s10, [#allocation14], %s862_s2, %s862_s2, %s863_s13  }
 0x31c   :  { %s826_s23 = scalar_lea.vmem %s1010_s28, 256  ;;  %p831_p7 = scmp.lt.s32.totalorder %s1010_s28, %s1010_s28 }
 0x31d   :  { %p827_p6 = scmp.ne.s32.totalorder %s1010_s28, %s826_s23  ;;  %p832_p8 = scmp.lt.s32.totalorder %s826_s23, %s826_s23 }
 0x31f   :  { %p833_p9 = por %p832_p8, %p831_p7 }
 0x321   :  { %p834_p10 = pnand %p833_p9, %p827_p6 }
 0x323   :  { %837 = shalt.err (!%p834_p10)
}
 0x324   :  { %s838_s25 = scalar_lea.hbm %s1075_s8, 256 }
 0x325   :  { %p839_p11 = scmp.ne.s32.totalorder %s1075_s8, %s838_s25  ;;  %p842_p12 = scmp.lt.u32.totalorder %s838_s25, %s1075_s8 }
 0x327   :  { %p844_p13 = pnand %p842_p12, %p839_p11 }
 0x329   :  { %847 = shalt.err (!%p844_p13)
}
 0x32a   :  { %454 = dma.vmem_to_hbm [thread:$0]  %s1010_s28, 256, %s1075_s8, [#allocation6], %s862_s2, %s862_s2, %s863_s13  }
 0x32b   :  { %854 = dma.done.wait [#allocation6], 256  }
 0x32c   :  { %855 = vsyncadd [#allocation6], 4294967040 }
 0x32d   :  { %856 = dma.done.wait [#allocation14], 512  }
 0x32e   :  { %857 = vsyncadd [#allocation14], 4294966784 }
 0x32f   :  { %488 = vsyncpa [#allocation5], 1 }
 0x330   :  { %489 = vsyncpa [#allocation8], 1 }
 0x331   :  { %490 = vsyncpa [#allocation11], 1 }
 0x332   :  { %491 = vsyncpa [#allocation6], 1 }
 0x333   :  { %492 = vsyncpa [#allocation14], 1 }

</bundles_post_ra>
